<compile_context>
chip_gen: v5e
topology: v5e:2x2
jax: 0.10.0
libtpu: 0.0.40
codegen_flags: <defaults>
</compile_context>

<pallas_src>
import functools

import numpy as np
import jax
import jax.numpy as jnp
from jax.experimental import pallas as pl
from jax.experimental.pallas import tpu as pltpu

POOL_K = 52                       # nn.MaxPool1d(kernel_size=52, stride=1)
BN_EPS = 1e-5                     # nn.BatchNorm1d default eps
F32 = jnp.float32
MXU_ROWS = 256                    # MXU-native row count (v6e/v7x); 2x128 on v5e
TILE_BUDGET = 16 << 20            # per-tile VMEM working-set budget
FUSED_SCRATCH_BUDGET = 16 << 20   # max resident f32 conv-output stash (fused path)
VMEM_LIMIT_CAP = 40 << 20         # leave headroom on v7x (64 MiB per TensorCore)


# -----------------------------------------------------------------------------
# In-kernel helpers (traced inline)
# -----------------------------------------------------------------------------
def _conv_rows(x_ref, w_ref, bias_ref):
    """3-tap circular Conv1d on a (rows = batch*channel, lanes = sequence) tile.

    x_ref:    (tbc, S)       activations (f32 or bf16)
    w_ref:    (3, tbc, tbc)  w_ref[k] = kron(I_tb, W_k)  (block diagonal)
    bias_ref: (tbc, 1)       f32 conv bias per row
    returns   (tbc, S) f32:
      y[b*C+o, t] = bias[o] + sum_{k,i} W_k[o,i] * x[b*C+i, (t + k - 1) mod S]
    """
    S = x_ref.shape[-1]
    x = x_ref[...]
    # Center tap needs no shift; outer taps are cheap XLU lane rotations.
    y = jnp.dot(w_ref[1], x, preferred_element_type=F32)
    y = y + jnp.dot(w_ref[0], pltpu.roll(x, 1, axis=1),
                    preferred_element_type=F32)        # x[t - 1]
    y = y + jnp.dot(w_ref[2], pltpu.roll(x, S - 1, axis=1),
                    preferred_element_type=F32)        # x[t + 1]
    return y + bias_ref[...]


def _sliding_window_max(a, window):
    """Log-time sliding-window max along lanes: out[:, t] = max(a[:, t:t+window]).

    Positions t > S - window hold circularly-wrapped garbage; callers slice it
    off on the host.  6 rolls + 6 maximums for window = 52.
    """
    S = a.shape[-1]
    m = a
    w = 1
    while 2 * w <= window:                         # windows 2, 4, 8, 16, 32
        m = jnp.maximum(m, pltpu.roll(m, S - w, axis=1))
        w *= 2
    if w < window:                                 # 32 -> 52 (overlapping merge)
        m = jnp.maximum(m, pltpu.roll(m, S - (window - w), axis=1))
    return m


def _elu(y):
    # ELU(alpha=1); exp runs on the EUP, min() keeps the dead branch finite.
    return jnp.where(y > 0.0, y, jnp.exp(jnp.minimum(y, 0.0)) - 1.0)


# -----------------------------------------------------------------------------
# Fused kernel: conv + BatchNorm(batch stats) + ELU + MaxPool in one pallas_call
# grid = (2, nb): phase 0 = conv + stats, phase 1 = BN affine + ELU + pool.
# -----------------------------------------------------------------------------
def _fused_kernel(x_ref, w_ref, bias_ref, gamma_ref, beta_ref, pmat_ref, pmt_ref,
                  o_ref, conv_ref, sum_ref, sq_ref, scale_ref, shift_ref, *, inv_n):
    phase = pl.program_id(0)
    i = pl.program_id(1)

    @pl.when(phase == 0)
    def _stats_phase():
        @pl.when(i == 0)
        def _():
            sum_ref[...] = jnp.zeros_like(sum_ref)
            sq_ref[...] = jnp.zeros_like(sq_ref)

        y = _conv_rows(x_ref, w_ref, bias_ref)              # (tbc, S) f32
        conv_ref[i] = y                                     # stash for phase 1
        rs = jnp.sum(y, axis=1, keepdims=True)              # (tbc, 1)
        rq = jnp.sum(y * y, axis=1, keepdims=True)
        # Fold the within-tile batch reduction into a tiny matmul (no reshapes):
        # pmat[c, r] = 1 iff r % C == c.
        sum_ref[...] += jnp.dot(pmat_ref[...], rs, preferred_element_type=F32)
        sq_ref[...] += jnp.dot(pmat_ref[...], rq, preferred_element_type=F32)

    @pl.when(phase == 1)
    def _apply_phase():
        @pl.when(i == 0)
        def _():
            # Finalize BatchNorm (training-mode batch stats) -> per-row affine.
            mean = sum_ref[...] * inv_n                      # (C, 1)
            var = sq_ref[...] * inv_n - mean * mean
            scale = gamma_ref[...] * jax.lax.rsqrt(var + BN_EPS)
            shift = beta_ref[...] - mean * scale
            # Broadcast (C,1) -> (tbc,1) rows via pmt = pmat.T (tiny matmul).
            scale_ref[...] = jnp.dot(pmt_ref[...], scale, preferred_element_type=F32)
            shift_ref[...] = jnp.dot(pmt_ref[...], shift, preferred_element_type=F32)

        y = conv_ref[i]                                      # (tbc, S) f32
        yn = y * scale_ref[...] + shift_ref[...]
        o_ref[...] = _sliding_window_max(_elu(yn), POOL_K).astype(o_ref.dtype)


# -----------------------------------------------------------------------------
# Two-pass fallback kernels (large B*C*S): pass 1 stats, pass 2 apply.
# -----------------------------------------------------------------------------
def _stats_kernel(x_ref, w_ref, bias_ref, stat_ref):
    y = _conv_rows(x_ref, w_ref, bias_ref)                  # (tbc, S) f32
    stat_ref[:, 0:1] = jnp.sum(y, axis=1, keepdims=True)
    stat_ref[:, 1:2] = jnp.sum(y * y, axis=1, keepdims=True)


def _apply_kernel(x_ref, w_ref, bias_ref, scale_ref, shift_ref, o_ref):
    y = _conv_rows(x_ref, w_ref, bias_ref)                  # (tbc, S) f32
    yn = y * scale_ref[...] + shift_ref[...]
    # Lane-dense store at the full S width; host slices to lout.
    o_ref[...] = _sliding_window_max(_elu(yn), POOL_K).astype(o_ref.dtype)


# -----------------------------------------------------------------------------
# Host-side tiling / VMEM accounting
# -----------------------------------------------------------------------------
def _tile_vmem_bytes(tbc, S, in_es, out_es):
    act = tbc * S
    return (2 * act * in_es            # x block (double buffered)
            + 2 * act * out_es         # output block (double buffered)
            + 6 * tbc * tbc * in_es    # 3-tap block-diag conv weights (double buffered)
            + 2 * act * in_es          # rolled copies of x inside the kernel
            + 6 * act * 4              # f32 temporaries (conv / ELU / pool chain)
            + (256 << 10))             # small operands (bias, scale, pmat, ...)


def _pick_tb(B, C, S, in_es, out_es, *, prefer_multi_step):
    divs = [d for d in range(1, B + 1) if B % d == 0]
    # (8,128) rule: the block's second-minor dim (tb*C) must be 8-aligned unless
    # the block spans the whole array (tb == B).
    cands = [tb for tb in divs if (tb * C) % 8 == 0 or tb == B]
    # Cap rows at the MXU-native row count: kron(I_tb, W_k) is block diagonal,
    # so rows past 256 only add wasted vmatmul work + quadratic weight VMEM.
    capped = [tb for tb in cands if tb * C <= MXU_ROWS] or [min(cands)]
    fits = [tb for tb in capped
            if _tile_vmem_bytes(tb * C, S, in_es, out_es) <= TILE_BUDGET]
    fits = fits or [min(capped)]
    if prefer_multi_step and B >= 2:
        # v7x: keep >= 2 steps on the parallel axis so both TensorCores work.
        multi = [tb for tb in fits if B // tb >= 2]
        if multi:
            return max(multi)
    return max(fits)


# -----------------------------------------------------------------------------
# Host wrapper
# -----------------------------------------------------------------------------
def conv_layer_forward(x, w, b, gamma, beta, *, batch_tile=None,
                       force_two_pass=False):
    """ConvLayer forward.

    x:     (S, B, C)  activations (f32 or bf16; other floats are upcast to f32).
    w:     (C, C, 3)  Conv1d weight in PyTorch layout (out, in, k).
    b:     (C,)       Conv1d bias.
    gamma: (C,)       BatchNorm1d weight.
    beta:  (C,)       BatchNorm1d bias.
    Returns (S - 51, B, C), matching the nn.Module (training-mode BatchNorm).
    """
    S, B, C = x.shape
    assert S >= POOL_K, "sequence length must be >= MaxPool kernel size (52)"
    lout = S - POOL_K + 1

    cdtype = jnp.bfloat16 if x.dtype == jnp.bfloat16 else F32
    out_dtype = cdtype
    in_es = jnp.dtype(cdtype).itemsize
    out_es = jnp.dtype(out_dtype).itemsize

    conv_scratch_bytes = B * C * S * 4
    use_fused = (not force_two_pass) and conv_scratch_bytes <= FUSED_SCRATCH_BUDGET

    if batch_tile is not None:
        tb = int(batch_tile)
        assert B % tb == 0 and ((tb * C) % 8 == 0 or tb == B), (B, C, tb)
    else:
        tb = _pick_tb(B, C, S, in_es, out_es, prefer_multi_step=not use_fused)
    nb = B // tb
    tbc = tb * C

    # VMEM accounting (now includes the conv weights and the fused stash).
    est = _tile_vmem_bytes(tbc, S, in_es, out_es)
    if use_fused:
        est += conv_scratch_bytes
    want = est + (4 << 20)
    vmem_limit = int(min(max(want, 16 << 20), VMEM_LIMIT_CAP))
    if want > VMEM_LIMIT_CAP:       # pathological shapes: v5e/v6e (128 MiB) can still fit
        vmem_limit = int(min(want, 100 << 20))

    # (S, B, C) -> (B, C, S) -> (B*C, S): sequence on the 128-lane axis.
    xr = jnp.transpose(x, (1, 2, 0)).reshape(B * C, S).astype(cdtype)

    # Block-diagonal conv weights, one (tbc, tbc) block per tap.
    eye_tb = jnp.eye(tb, dtype=F32)
    wstk = jnp.stack([jnp.kron(eye_tb, w[:, :, k].astype(F32)) for k in range(3)],
                     axis=0).astype(cdtype)                       # (3, tbc, tbc)
    bias_rows = jnp.tile(b.astype(F32), tb).reshape(tbc, 1)       # row -> b[row % C]

    if use_fused:
        # Channel-selection matrices: pmat[c, r] = pmt[r, c] = 1 iff r % C == c.
        pmat = jnp.tile(jnp.eye(C, dtype=F32), (1, tb))           # (C, tbc)
        pmt = jnp.tile(jnp.eye(C, dtype=F32), (tb, 1))            # (tbc, C)
        gamma_col = gamma.astype(F32).reshape(C, 1)
        beta_col = beta.astype(F32).reshape(C, 1)

        kern = functools.partial(_fused_kernel, inv_n=1.0 / float(B * S))
        out2d = pl.pallas_call(
            kern,
            out_shape=jax.ShapeDtypeStruct((B * C, S), out_dtype),
            grid=(2, nb),
            in_specs=[
                # phase 0 walks the tiles; phase 1 keeps the last block resident
                # (no redundant DMA of x in phase 1).
                pl.BlockSpec((tbc, S), lambda p, i: ((1 - p) * i + p * (nb - 1), 0)),
                pl.BlockSpec((3, tbc, tbc), lambda p, i: (0, 0, 0)),
                pl.BlockSpec((tbc, 1), lambda p, i: (0, 0)),
                pl.BlockSpec((C, 1), lambda p, i: (0, 0)),
                pl.BlockSpec((C, 1), lambda p, i: (0, 0)),
                pl.BlockSpec((C, tbc), lambda p, i: (0, 0)),
                pl.BlockSpec((tbc, C), lambda p, i: (0, 0)),
            ],
            # Phase 0 never writes the output; keep it parked on block 0 so no
            # uninitialized data is ever flushed, phase 1 writes block i.
            out_specs=pl.BlockSpec((tbc, S), lambda p, i: (p * i, 0)),
            scratch_shapes=[
                pltpu.VMEM((nb, tbc, S), F32),   # resident conv-output stash
                pltpu.VMEM((C, 1), F32),         # per-channel sum
                pltpu.VMEM((C, 1), F32),         # per-channel sum of squares
                pltpu.VMEM((tbc, 1), F32),       # folded BN scale per row
                pltpu.VMEM((tbc, 1), F32),       # folded BN shift per row
            ],
            compiler_params=pltpu.CompilerParams(
                dimension_semantics=("arbitrary", "arbitrary"),
                vmem_limit_bytes=vmem_limit),
        )(xr, wstk, bias_rows, gamma_col, beta_col, pmat, pmt)
    else:
        cparams = pltpu.CompilerParams(
            dimension_semantics=("parallel",),   # batch tiles -> both TCs on v7x
            vmem_limit_bytes=vmem_limit)
        common_in_specs = [
            pl.BlockSpec((tbc, S), lambda i: (i, 0)),
            pl.BlockSpec((3, tbc, tbc), lambda i: (0, 0, 0)),
            pl.BlockSpec((tbc, 1), lambda i: (0, 0)),
        ]

        # Pass 1: per-(batch, channel) sum & sum-of-squares of the conv output.
        row_stats = pl.pallas_call(
            _stats_kernel,
            out_shape=jax.ShapeDtypeStruct((B * C, 2), F32),
            grid=(nb,),
            in_specs=common_in_specs,
            out_specs=pl.BlockSpec((tbc, 2), lambda i: (i, 0)),
            compiler_params=cparams,
        )(xr, wstk, bias_rows)

        # Tiny cross-tile reduction + BN affine folding in plain JAX (f32).
        ch = jnp.sum(row_stats.reshape(B, C, 2), axis=0)          # (C, 2)
        n = float(B * S)
        mean = ch[:, 0] / n
        var = ch[:, 1] / n - mean * mean                          # biased (training BN)
        scale = gamma.astype(F32) * jax.lax.rsqrt(var + BN_EPS)
        shift = beta.astype(F32) - mean * scale
        scale_rows = jnp.tile(scale, tb).reshape(tbc, 1)
        shift_rows = jnp.tile(shift, tb).reshape(tbc, 1)

        # Pass 2: conv (recomputed) + BN affine + ELU + pool, lane-dense output.
        out2d = pl.pallas_call(
            _apply_kernel,
            out_shape=jax.ShapeDtypeStruct((B * C, S), out_dtype),
            grid=(nb,),
            in_specs=common_in_specs + [
                pl.BlockSpec((tbc, 1), lambda i: (0, 0)),
                pl.BlockSpec((tbc, 1), lambda i: (0, 0)),
            ],
            out_specs=pl.BlockSpec((tbc, S), lambda i: (i, 0)),
            compiler_params=cparams,
        )(xr, wstk, bias_rows, scale_rows, shift_rows)

    # Slice the valid pooled window on the host (kernel stores were lane-dense),
    # then (B*C, Lout) -> (Lout, B, C), matching the module's permute(2, 0, 1).
    out2d = out2d[:, :lout]
    return jnp.transpose(out2d.reshape(B, C, lout), (2, 0, 1))


# -----------------------------------------------------------------------------
# Pure-JAX reference mirroring the PyTorch module (training-mode BatchNorm)
# -----------------------------------------------------------------------------
def ref_forward(x, w, b, gamma, beta):
    xb = jnp.transpose(x, (1, 2, 0)).astype(jnp.float32)           # (B, C, S)
    B, C, S = xb.shape
    xpad = jnp.concatenate([xb[:, :, -1:], xb, xb[:, :, :1]], axis=2)  # circular pad 1
    y = jnp.zeros((B, C, S), jnp.float32)
    for k in range(3):
        y = y + jnp.einsum("oi,bit->bot", w[:, :, k].astype(jnp.float32),
                           xpad[:, :, k:k + S])
    y = y + b[None, :, None]
    mu = jnp.mean(y, axis=(0, 2), keepdims=True)
    var = jnp.mean((y - mu) ** 2, axis=(0, 2), keepdims=True)
    yn = (y - mu) / jnp.sqrt(var + BN_EPS) * gamma[None, :, None] + beta[None, :, None]
    a = jnp.where(yn > 0.0, yn, jnp.exp(jnp.minimum(yn, 0.0)) - 1.0)
    lout = S - POOL_K + 1
    pooled = a[:, :, :lout]
    for k in range(1, POOL_K):
        pooled = jnp.maximum(pooled, a[:, :, k:k + lout])
    return jnp.transpose(pooled, (2, 0, 1))                        # (Lout, B, C)


# TODO(synk): BatchNorm1d's running_mean/running_var buffer updates (a training-
# mode side effect, not part of the returned tensor) are not materialized.

if __name__ == "__main__":
    # Small shapes; seq must be >= 52 because MaxPool1d(52) is hardcoded.
    S, B, C = 128, 4, 8

    key = jax.random.PRNGKey(0)
    kx, kw, kb = jax.random.split(key, 3)

    x = jax.random.normal(kx, (S, B, C), dtype=jnp.float32)

    # Deterministic synthetic parameters, torch Conv1d(C, C, 3) layout (out, in, k).
    fan_in = C * 3
    bound = 1.0 / np.sqrt(fan_in)
    w = jax.random.uniform(kw, (C, C, 3), jnp.float32, -bound, bound)
    b = jax.random.uniform(kb, (C,), jnp.float32, -bound, bound)
    gamma = jnp.ones((C,), jnp.float32)   # BatchNorm1d default init
    beta = jnp.zeros((C,), jnp.float32)

    ref = ref_forward(x, w, b, gamma, beta)
    fwd = jax.jit(conv_layer_forward, static_argnames=("batch_tile", "force_two_pass"))

    # Fused single-call path, auto tile (nb = 1).
    out = jax.block_until_ready(fwd(x, w, b, gamma, beta))
    assert out.shape == (S - POOL_K + 1, B, C), out.shape
    np.testing.assert_allclose(np.asarray(out), np.asarray(ref), rtol=2e-4, atol=2e-4)

    # Fused path with multiple batch tiles (exercises the phase/tile indexing).
    out_t = jax.block_until_ready(fwd(x, w, b, gamma, beta, batch_tile=2))
    np.testing.assert_allclose(np.asarray(out_t), np.asarray(ref), rtol=2e-4, atol=2e-4)

    # Two-pass fallback path (used for large B*C*S).
    out_2p = jax.block_until_ready(
        fwd(x, w, b, gamma, beta, batch_tile=2, force_two_pass=True))
    np.testing.assert_allclose(np.asarray(out_2p), np.asarray(ref), rtol=2e-4, atol=2e-4)

    print("KERNEL_OK")
</pallas_src>

<mosaic_0001>
module attributes {stable_mosaic.version = 11 : i64} {
  func.func @_fused_kernel(%arg0: i32, %arg1: i32, %arg2: memref<32x128xf32, #tpu.memory_space<vmem>>, %arg3: memref<3x32x32xf32, #tpu.memory_space<vmem>>, %arg4: memref<32x1xf32, #tpu.memory_space<vmem>>, %arg5: memref<8x1xf32, #tpu.memory_space<vmem>>, %arg6: memref<8x1xf32, #tpu.memory_space<vmem>>, %arg7: memref<8x32xf32, #tpu.memory_space<vmem>>, %arg8: memref<32x8xf32, #tpu.memory_space<vmem>>, %arg9: memref<32x128xf32, #tpu.memory_space<vmem>>, %arg10: memref<1x32x128xf32, #tpu.memory_space<vmem>>, %arg11: memref<8x1xf32, #tpu.memory_space<vmem>>, %arg12: memref<8x1xf32, #tpu.memory_space<vmem>>, %arg13: memref<32x1xf32, #tpu.memory_space<vmem>>, %arg14: memref<32x1xf32, #tpu.memory_space<vmem>>) attributes {dimension_semantics = [#tpu.dimension_semantics<arbitrary>, #tpu.dimension_semantics<arbitrary>], iteration_bounds = array<i64: 2, 1>, scalar_prefetch = 0 : i64, scratch_operands = 5 : i64, tpu.core_type = #tpu.core_type<tc>, window_params = [{transform_indices = @transform_0, window_bounds = array<i64: 32, 128>}, {pipeline_mode = #tpu.pipeline_mode<synchronous>, transform_indices = @transform_1, window_bounds = array<i64: 3, 32, 32>}, {pipeline_mode = #tpu.pipeline_mode<synchronous>, transform_indices = @transform_2, window_bounds = array<i64: 32, 1>}, {pipeline_mode = #tpu.pipeline_mode<synchronous>, transform_indices = @transform_3, window_bounds = array<i64: 8, 1>}, {pipeline_mode = #tpu.pipeline_mode<synchronous>, transform_indices = @transform_4, window_bounds = array<i64: 8, 1>}, {pipeline_mode = #tpu.pipeline_mode<synchronous>, transform_indices = @transform_5, window_bounds = array<i64: 8, 32>}, {pipeline_mode = #tpu.pipeline_mode<synchronous>, transform_indices = @transform_6, window_bounds = array<i64: 32, 8>}, {transform_indices = @transform_7, window_bounds = array<i64: 32, 128>}]} {
    %c0_i32 = arith.constant 0 : i32
    %0 = arith.cmpi eq, %arg0, %c0_i32 : i32
    %1 = arith.extui %0 : i1 to i32
    %c0_i32_0 = arith.constant 0 : i32
    %2 = arith.cmpi ne, %1, %c0_i32_0 : i32
    scf.if %2 {
      %c0_i32_2 = arith.constant 0 : i32
      %6 = arith.cmpi eq, %arg1, %c0_i32_2 : i32
      %7 = arith.extui %6 : i1 to i32
      %c0_i32_3 = arith.constant 0 : i32
      %8 = arith.cmpi ne, %7, %c0_i32_3 : i32
      scf.if %8 {
        %cst_35 = arith.constant 0.000000e+00 : f32
        %45 = vector.broadcast %cst_35 : f32 to vector<8x1xf32>
        %c0_36 = arith.constant 0 : index
        %c0_37 = arith.constant 0 : index
        %46 = vector.load %arg11[%c0_36, %c0_37] : memref<8x1xf32, #tpu.memory_space<vmem>>, vector<8x1xf32>
        tpu.vector_store %arg11[%c0_36, %c0_37], %45 {strides = array<i32>} : memref<8x1xf32, #tpu.memory_space<vmem>>, vector<8x1xf32>,
        %cst_38 = arith.constant 0.000000e+00 : f32
        %47 = vector.broadcast %cst_38 : f32 to vector<8x1xf32>
        %c0_39 = arith.constant 0 : index
        %c0_40 = arith.constant 0 : index
        %48 = vector.load %arg12[%c0_39, %c0_40] : memref<8x1xf32, #tpu.memory_space<vmem>>, vector<8x1xf32>
        tpu.vector_store %arg12[%c0_39, %c0_40], %47 {strides = array<i32>} : memref<8x1xf32, #tpu.memory_space<vmem>>, vector<8x1xf32>,
      } else {
      }
      %c0 = arith.constant 0 : index
      %c0_4 = arith.constant 0 : index
      %9 = vector.load %arg2[%c0, %c0_4] : memref<32x128xf32, #tpu.memory_space<vmem>>, vector<32x128xf32>
      %c1 = arith.constant 1 : index
      %c0_5 = arith.constant 0 : index
      %c0_6 = arith.constant 0 : index
      %10 = vector.load %arg3[%c1, %c0_5, %c0_6] : memref<3x32x32xf32, #tpu.memory_space<vmem>>, vector<1x32x32xf32>
      %11 = vector.shape_cast %10 : vector<1x32x32xf32> to vector<32x32xf32>
      %cst = arith.constant dense<0.000000e+00> : vector<32x128xf32>
      %12 = tpu.matmul %11, %9, %cst {dimension_numbers = #tpu.dot_dimension_numbers<[1], [0], [0], [1], [0, 0, 1, 1], [], []>} : vector<32x32xf32>, vector<32x128xf32>, vector<32x128xf32> -> vector<32x128xf32>
      %c0_7 = arith.constant 0 : index
      %c0_8 = arith.constant 0 : index
      %c0_9 = arith.constant 0 : index
      %13 = vector.load %arg3[%c0_7, %c0_8, %c0_9] : memref<3x32x32xf32, #tpu.memory_space<vmem>>, vector<1x32x32xf32>
      %14 = vector.shape_cast %13 : vector<1x32x32xf32> to vector<32x32xf32>
      %c1_i32_10 = arith.constant 1 : i32
      %15 = tpu.dynamic_rotate %9 by %c1_i32_10 dim 1 : vector<32x128xf32>, i32 -> vector<32x128xf32>
      %cst_11 = arith.constant dense<0.000000e+00> : vector<32x128xf32>
      %16 = tpu.matmul %14, %15, %cst_11 {dimension_numbers = #tpu.dot_dimension_numbers<[1], [0], [0], [1], [0, 0, 1, 1], [], []>} : vector<32x32xf32>, vector<32x128xf32>, vector<32x128xf32> -> vector<32x128xf32>
      %17 = arith.addf %12, %16 : vector<32x128xf32>
      %c2 = arith.constant 2 : index
      %c0_12 = arith.constant 0 : index
      %c0_13 = arith.constant 0 : index
      %18 = vector.load %arg3[%c2, %c0_12, %c0_13] : memref<3x32x32xf32, #tpu.memory_space<vmem>>, vector<1x32x32xf32>
      %19 = vector.shape_cast %18 : vector<1x32x32xf32> to vector<32x32xf32>
      %c127_i32 = arith.constant 127 : i32
      %20 = tpu.dynamic_rotate %9 by %c127_i32 dim 1 : vector<32x128xf32>, i32 -> vector<32x128xf32>
      %cst_14 = arith.constant dense<0.000000e+00> : vector<32x128xf32>
      %21 = tpu.matmul %19, %20, %cst_14 {dimension_numbers = #tpu.dot_dimension_numbers<[1], [0], [0], [1], [0, 0, 1, 1], [], []>} : vector<32x32xf32>, vector<32x128xf32>, vector<32x128xf32> -> vector<32x128xf32>
      %22 = arith.addf %17, %21 : vector<32x128xf32>
      %c0_15 = arith.constant 0 : index
      %c0_16 = arith.constant 0 : index
      %23 = vector.load %arg4[%c0_15, %c0_16] : memref<32x1xf32, #tpu.memory_space<vmem>>, vector<32x1xf32>
      %24 = vector.broadcast %23 : vector<32x1xf32> to vector<32x128xf32>
      %25 = arith.addf %22, %24 : vector<32x128xf32>
      %26 = arith.index_cast %arg1 : i32 to index
      %c0_17 = arith.constant 0 : index
      %c0_18 = arith.constant 0 : index
      %27 = vector.load %arg10[%26, %c0_17, %c0_18] : memref<1x32x128xf32, #tpu.memory_space<vmem>>, vector<1x32x128xf32>
      %28 = vector.shape_cast %27 : vector<1x32x128xf32> to vector<32x128xf32>
      %29 = vector.shape_cast %25 : vector<32x128xf32> to vector<1x32x128xf32>
      tpu.vector_store %arg10[%26, %c0_17, %c0_18], %29 {strides = array<i32>} : memref<1x32x128xf32, #tpu.memory_space<vmem>>, vector<1x32x128xf32>,
      %cst_19 = arith.constant dense<0.000000e+00> : vector<32xf32>
      %30 = vector.multi_reduction <add>, %25, %cst_19 [1] : vector<32x128xf32> to vector<32xf32>
      %31 = vector.shape_cast %30 : vector<32xf32> to vector<32x1xf32>
      %32 = arith.mulf %25, %25 : vector<32x128xf32>
      %cst_20 = arith.constant dense<0.000000e+00> : vector<32xf32>
      %33 = vector.multi_reduction <add>, %32, %cst_20 [1] : vector<32x128xf32> to vector<32xf32>
      %34 = vector.shape_cast %33 : vector<32xf32> to vector<32x1xf32>
      %c0_21 = arith.constant 0 : index
      %c0_22 = arith.constant 0 : index
      %35 = vector.load %arg11[%c0_21, %c0_22] : memref<8x1xf32, #tpu.memory_space<vmem>>, vector<8x1xf32>
      %c0_23 = arith.constant 0 : index
      %c0_24 = arith.constant 0 : index
      %36 = vector.load %arg7[%c0_23, %c0_24] : memref<8x32xf32, #tpu.memory_space<vmem>>, vector<8x32xf32>
      %cst_25 = arith.constant dense<0.000000e+00> : vector<8x1xf32>
      %37 = tpu.matmul %36, %31, %cst_25 {dimension_numbers = #tpu.dot_dimension_numbers<[1], [0], [0], [1], [0, 0, 1, 1], [], []>} : vector<8x32xf32>, vector<32x1xf32>, vector<8x1xf32> -> vector<8x1xf32>
      %38 = arith.addf %35, %37 : vector<8x1xf32>
      %c0_26 = arith.constant 0 : index
      %c0_27 = arith.constant 0 : index
      %39 = vector.load %arg11[%c0_26, %c0_27] : memref<8x1xf32, #tpu.memory_space<vmem>>, vector<8x1xf32>
      tpu.vector_store %arg11[%c0_26, %c0_27], %38 {strides = array<i32>} : memref<8x1xf32, #tpu.memory_space<vmem>>, vector<8x1xf32>,
      %c0_28 = arith.constant 0 : index
      %c0_29 = arith.constant 0 : index
      %40 = vector.load %arg12[%c0_28, %c0_29] : memref<8x1xf32, #tpu.memory_space<vmem>>, vector<8x1xf32>
      %c0_30 = arith.constant 0 : index
      %c0_31 = arith.constant 0 : index
      %41 = vector.load %arg7[%c0_30, %c0_31] : memref<8x32xf32, #tpu.memory_space<vmem>>, vector<8x32xf32>
      %cst_32 = arith.constant dense<0.000000e+00> : vector<8x1xf32>
      %42 = tpu.matmul %41, %34, %cst_32 {dimension_numbers = #tpu.dot_dimension_numbers<[1], [0], [0], [1], [0, 0, 1, 1], [], []>} : vector<8x32xf32>, vector<32x1xf32>, vector<8x1xf32> -> vector<8x1xf32>
      %43 = arith.addf %40, %42 : vector<8x1xf32>
      %c0_33 = arith.constant 0 : index
      %c0_34 = arith.constant 0 : index
      %44 = vector.load %arg12[%c0_33, %c0_34] : memref<8x1xf32, #tpu.memory_space<vmem>>, vector<8x1xf32>
      tpu.vector_store %arg12[%c0_33, %c0_34], %43 {strides = array<i32>} : memref<8x1xf32, #tpu.memory_space<vmem>>, vector<8x1xf32>,
    } else {
    }
    %c1_i32 = arith.constant 1 : i32
    %3 = arith.cmpi eq, %arg0, %c1_i32 : i32
    %4 = arith.extui %3 : i1 to i32
    %c0_i32_1 = arith.constant 0 : i32
    %5 = arith.cmpi ne, %4, %c0_i32_1 : i32
    scf.if %5 {
      %c0_i32_2 = arith.constant 0 : i32
      %6 = arith.cmpi eq, %arg1, %c0_i32_2 : i32
      %7 = arith.extui %6 : i1 to i32
      %c0_i32_3 = arith.constant 0 : i32
      %8 = arith.cmpi ne, %7, %c0_i32_3 : i32
      scf.if %8 {
        %c0_13 = arith.constant 0 : index
        %c0_14 = arith.constant 0 : index
        %39 = vector.load %arg11[%c0_13, %c0_14] : memref<8x1xf32, #tpu.memory_space<vmem>>, vector<8x1xf32>
        %cst_15 = arith.constant 0.001953125 : f32
        %40 = vector.broadcast %cst_15 : f32 to vector<8x1xf32>
        %41 = arith.mulf %39, %40 : vector<8x1xf32>
        %c0_16 = arith.constant 0 : index
        %c0_17 = arith.constant 0 : index
        %42 = vector.load %arg12[%c0_16, %c0_17] : memref<8x1xf32, #tpu.memory_space<vmem>>, vector<8x1xf32>
        %cst_18 = arith.constant 0.001953125 : f32
        %43 = vector.broadcast %cst_18 : f32 to vector<8x1xf32>
        %44 = arith.mulf %42, %43 : vector<8x1xf32>
        %45 = arith.mulf %41, %41 : vector<8x1xf32>
        %46 = arith.subf %44, %45 : vector<8x1xf32>
        %c0_19 = arith.constant 0 : index
        %c0_20 = arith.constant 0 : index
        %47 = vector.load %arg5[%c0_19, %c0_20] : memref<8x1xf32, #tpu.memory_space<vmem>>, vector<8x1xf32>
        %cst_21 = arith.constant 9.99999974E-6 : f32
        %48 = vector.broadcast %cst_21 : f32 to vector<8x1xf32>
        %49 = arith.addf %46, %48 : vector<8x1xf32>
        %50 = math.rsqrt %49 : vector<8x1xf32>
        %51 = arith.mulf %47, %50 : vector<8x1xf32>
        %c0_22 = arith.constant 0 : index
        %c0_23 = arith.constant 0 : index
        %52 = vector.load %arg6[%c0_22, %c0_23] : memref<8x1xf32, #tpu.memory_space<vmem>>, vector<8x1xf32>
        %53 = arith.mulf %41, %51 : vector<8x1xf32>
        %54 = arith.subf %52, %53 : vector<8x1xf32>
        %c0_24 = arith.constant 0 : index
        %c0_25 = arith.constant 0 : index
        %55 = vector.load %arg8[%c0_24, %c0_25] : memref<32x8xf32, #tpu.memory_space<vmem>>, vector<32x8xf32>
        %cst_26 = arith.constant dense<0.000000e+00> : vector<32x1xf32>
        %56 = tpu.matmul %55, %51, %cst_26 {dimension_numbers = #tpu.dot_dimension_numbers<[1], [0], [0], [1], [0, 0, 1, 1], [], []>} : vector<32x8xf32>, vector<8x1xf32>, vector<32x1xf32> -> vector<32x1xf32>
        %c0_27 = arith.constant 0 : index
        %c0_28 = arith.constant 0 : index
        %57 = vector.load %arg13[%c0_27, %c0_28] : memref<32x1xf32, #tpu.memory_space<vmem>>, vector<32x1xf32>
        tpu.vector_store %arg13[%c0_27, %c0_28], %56 {strides = array<i32>} : memref<32x1xf32, #tpu.memory_space<vmem>>, vector<32x1xf32>,
        %c0_29 = arith.constant 0 : index
        %c0_30 = arith.constant 0 : index
        %58 = vector.load %arg8[%c0_29, %c0_30] : memref<32x8xf32, #tpu.memory_space<vmem>>, vector<32x8xf32>
        %cst_31 = arith.constant dense<0.000000e+00> : vector<32x1xf32>
        %59 = tpu.matmul %58, %54, %cst_31 {dimension_numbers = #tpu.dot_dimension_numbers<[1], [0], [0], [1], [0, 0, 1, 1], [], []>} : vector<32x8xf32>, vector<8x1xf32>, vector<32x1xf32> -> vector<32x1xf32>
        %c0_32 = arith.constant 0 : index
        %c0_33 = arith.constant 0 : index
        %60 = vector.load %arg14[%c0_32, %c0_33] : memref<32x1xf32, #tpu.memory_space<vmem>>, vector<32x1xf32>
        tpu.vector_store %arg14[%c0_32, %c0_33], %59 {strides = array<i32>} : memref<32x1xf32, #tpu.memory_space<vmem>>, vector<32x1xf32>,
      } else {
      }
      %9 = arith.index_cast %arg1 : i32 to index
      %c0 = arith.constant 0 : index
      %c0_4 = arith.constant 0 : index
      %10 = vector.load %arg10[%9, %c0, %c0_4] : memref<1x32x128xf32, #tpu.memory_space<vmem>>, vector<1x32x128xf32>
      %11 = vector.shape_cast %10 : vector<1x32x128xf32> to vector<32x128xf32>
      %c0_5 = arith.constant 0 : index
      %c0_6 = arith.constant 0 : index
      %12 = vector.load %arg13[%c0_5, %c0_6] : memref<32x1xf32, #tpu.memory_space<vmem>>, vector<32x1xf32>
      %13 = vector.broadcast %12 : vector<32x1xf32> to vector<32x128xf32>
      %14 = arith.mulf %11, %13 : vector<32x128xf32>
      %c0_7 = arith.constant 0 : index
      %c0_8 = arith.constant 0 : index
      %15 = vector.load %arg14[%c0_7, %c0_8] : memref<32x1xf32, #tpu.memory_space<vmem>>, vector<32x1xf32>
      %16 = vector.broadcast %15 : vector<32x1xf32> to vector<32x128xf32>
      %17 = arith.addf %14, %16 : vector<32x128xf32>
      %cst = arith.constant 0.000000e+00 : f32
      %18 = vector.broadcast %cst : f32 to vector<32x128xf32>
      %19 = arith.cmpf ogt, %17, %18 : vector<32x128xf32>
      %cst_9 = arith.constant 0.000000e+00 : f32
      %20 = vector.broadcast %cst_9 : f32 to vector<32x128xf32>
      %21 = arith.minimumf %17, %20 : vector<32x128xf32>
      %22 = math.exp %21 : vector<32x128xf32>
      %cst_10 = arith.constant 1.000000e+00 : f32
      %23 = vector.broadcast %cst_10 : f32 to vector<32x128xf32>
      %24 = arith.subf %22, %23 : vector<32x128xf32>
      %25 = arith.select %19, %17, %24 : vector<32x128xi1>, vector<32x128xf32>
      %c127_i32 = arith.constant 127 : i32
      %26 = tpu.dynamic_rotate %25 by %c127_i32 dim 1 : vector<32x128xf32>, i32 -> vector<32x128xf32>
      %27 = arith.maximumf %25, %26 : vector<32x128xf32>
      %c126_i32 = arith.constant 126 : i32
      %28 = tpu.dynamic_rotate %27 by %c126_i32 dim 1 : vector<32x128xf32>, i32 -> vector<32x128xf32>
      %29 = arith.maximumf %27, %28 : vector<32x128xf32>
      %c124_i32 = arith.constant 124 : i32
      %30 = tpu.dynamic_rotate %29 by %c124_i32 dim 1 : vector<32x128xf32>, i32 -> vector<32x128xf32>
      %31 = arith.maximumf %29, %30 : vector<32x128xf32>
      %c120_i32 = arith.constant 120 : i32
      %32 = tpu.dynamic_rotate %31 by %c120_i32 dim 1 : vector<32x128xf32>, i32 -> vector<32x128xf32>
      %33 = arith.maximumf %31, %32 : vector<32x128xf32>
      %c112_i32 = arith.constant 112 : i32
      %34 = tpu.dynamic_rotate %33 by %c112_i32 dim 1 : vector<32x128xf32>, i32 -> vector<32x128xf32>
      %35 = arith.maximumf %33, %34 : vector<32x128xf32>
      %c108_i32 = arith.constant 108 : i32
      %36 = tpu.dynamic_rotate %35 by %c108_i32 dim 1 : vector<32x128xf32>, i32 -> vector<32x128xf32>
      %37 = arith.maximumf %35, %36 : vector<32x128xf32>
      %c0_11 = arith.constant 0 : index
      %c0_12 = arith.constant 0 : index
      %38 = vector.load %arg9[%c0_11, %c0_12] : memref<32x128xf32, #tpu.memory_space<vmem>>, vector<32x128xf32>
      tpu.vector_store %arg9[%c0_11, %c0_12], %37 {strides = array<i32>} : memref<32x128xf32, #tpu.memory_space<vmem>>, vector<32x128xf32>,
    } else {
    }
    return
  }
  func.func @transform_0(%arg0: i32, %arg1: i32) -> (i32, i32) {
    %c1_i32 = arith.constant 1 : i32
    %0 = arith.subi %c1_i32, %arg0 : i32
    %1 = arith.muli %0, %arg1 : i32
    %c0_i32 = arith.constant 0 : i32
    %2 = arith.muli %arg0, %c0_i32 : i32
    %3 = arith.addi %1, %2 : i32
    %c0_i32_0 = arith.constant 0 : i32
    %c0_i32_1 = arith.constant 0 : i32
    return %3, %c0_i32_0 : i32, i32
  }
  func.func @transform_1(%arg0: i32, %arg1: i32) -> (i32, i32, i32) {
    %c0_i32 = arith.constant 0 : i32
    %c0_i32_0 = arith.constant 0 : i32
    %c0_i32_1 = arith.constant 0 : i32
    %c0_i32_2 = arith.constant 0 : i32
    return %c0_i32, %c0_i32_0, %c0_i32_1 : i32, i32, i32
  }
  func.func @transform_2(%arg0: i32, %arg1: i32) -> (i32, i32) {
    %c0_i32 = arith.constant 0 : i32
    %c0_i32_0 = arith.constant 0 : i32
    %c0_i32_1 = arith.constant 0 : i32
    return %c0_i32, %c0_i32_0 : i32, i32
  }
  func.func @transform_3(%arg0: i32, %arg1: i32) -> (i32, i32) {
    %c0_i32 = arith.constant 0 : i32
    %c0_i32_0 = arith.constant 0 : i32
    %c0_i32_1 = arith.constant 0 : i32
    return %c0_i32, %c0_i32_0 : i32, i32
  }
  func.func @transform_4(%arg0: i32, %arg1: i32) -> (i32, i32) {
    %c0_i32 = arith.constant 0 : i32
    %c0_i32_0 = arith.constant 0 : i32
    %c0_i32_1 = arith.constant 0 : i32
    return %c0_i32, %c0_i32_0 : i32, i32
  }
  func.func @transform_5(%arg0: i32, %arg1: i32) -> (i32, i32) {
    %c0_i32 = arith.constant 0 : i32
    %c0_i32_0 = arith.constant 0 : i32
    %c0_i32_1 = arith.constant 0 : i32
    return %c0_i32, %c0_i32_0 : i32, i32
  }
  func.func @transform_6(%arg0: i32, %arg1: i32) -> (i32, i32) {
    %c0_i32 = arith.constant 0 : i32
    %c0_i32_0 = arith.constant 0 : i32
    %c0_i32_1 = arith.constant 0 : i32
    return %c0_i32, %c0_i32_0 : i32, i32
  }
  func.func @transform_7(%arg0: i32, %arg1: i32) -> (i32, i32) {
    %0 = arith.muli %arg0, %arg1 : i32
    %c0_i32 = arith.constant 0 : i32
    %c0_i32_0 = arith.constant 0 : i32
    return %0, %c0_i32 : i32, i32
  }
}

</mosaic_0001>

<bundles_post_ra>
// kernel: tile.24
= control target key start
LH: loop header
LB: loop body
LE: loop exit
PB: predicated region body
PF: predicated region fallthrough
CT: control target
= control target key end

     0   :  { %vm36_vm0 = vcmask 1047556   ;;  %s81_s22 = smov 8   ;;  %s82_s23 = smov 16   ;;  %vm38_vm1 = vcmask 64512   ;;  %vm48_vm2 = vcmask 261312   ;;  %vm58_vm3 = vcmask 195712   ;;  %s133_s0 = inlined_call_operand.vmem [shape: f32[8,4,8], index: 0, kind: input, shape index: {}]   ;;  %s134_s1 = inlined_call_operand.vmem [shape: f32[8,32], index: 1, kind: output, shape index: {}]  }
   0x1   :  { %v70_v0 = vld [vmem:[%s133_s0 + $0x1c] sm:$0xf]  ;;  %v71_v1 = vld [vmem:[%s133_s0 + $0x18] sm:$0xf]  ;;  %v72_v2 = vld [vmem:[%s133_s0 + $0x14] sm:$0xf] }
   0x2   :  { %7 = vst [vmem:[#allocation0 + $0x38] sm:$0xf] %v70_v0  ;;  %v73_v3 = vld [vmem:[%s133_s0 + $0x10] sm:$0xf]  ;;  %v74_v4 = vld [vmem:[%s133_s0 + $0xc] sm:$0xf] }
   0x3   :  { %11 = vst [vmem:[#allocation0 + $0x30] sm:$0xf] %v71_v1  ;;  %v75_v5 = vld [vmem:[%s133_s0 + $0x8] sm:$0xf]  ;;  %v76_v6 = vld [vmem:[%s133_s0 + $0x4] sm:$0xf] }
   0x4   :  { %15 = vst [vmem:[#allocation0 + $0x28] sm:$0xf] %v72_v2  ;;  %v32_v7 = vld [vmem:[%s133_s0] sm:$0xf]  ;;  %s80_s0 = smov 24   ;;  %vm68_vm4 = vcmask 130112  }
   0x5   :  { %19 = vst [vmem:[#allocation0 + $0x20] sm:$0xf] %v73_v3 }
   0x6   :  { %23 = vst [vmem:[#allocation0 + $0x18] sm:$0xf] %v74_v4 }
   0x7   :  { %27 = vst [vmem:[#allocation0 + $0x10] sm:$0xf] %v75_v5 }
   0x8   :  { %31 = vst [vmem:[#allocation0 + $0x8] sm:$0xf] %v76_v6 }
   0x9   :  { %33 = vst [vmem:[#allocation0] sm:$0xf] %v32_v7 }
   0xc   :  { %v43_v8 = vld [vmem:[#allocation0 + $0x3] ss:$8 sm:$0xf0]   ;;  %v63_v9 = vld [vmem:[#allocation0 + $0x1] ss:$8 sm:$0xf0]  }
   0xd   :  { %v53_v15 = vld [vmem:[#allocation0 + $0x2] ss:$8 sm:$0xf0]   ;;  %v35_v18 = vld [vmem:[#allocation0] ss:$8 sm:$0xf0]  }
  0x10   :  { %v41_v10 = vld [vmem:[#allocation0 + $0x3] ss:$8 sm:$0xf]   ;;  %v61_v12 = vld [vmem:[#allocation0 + $0x1] ss:$8 sm:$0xf]  }
  0x11   :  { %v45_v11 = vsel %vm36_vm0, %v43_v8, %v41_v10  ;;  %v65_v13 = vsel %vm36_vm0, %v63_v9, %v61_v12  ;;  %v51_v14 = vld [vmem:[#allocation0 + $0x2] ss:$8 sm:$0xf]   ;;  %v34_v17 = vld [vmem:[#allocation0] ss:$8 sm:$0xf]  }
  0x12   :  { %46 = vrot.lane.b32.xlu0 %v45_v11, %s80_s0  ;;  %66 = vrot.lane.b32.xlu1 %v65_v13, %s81_s22  ;;  %v55_v16 = vsel %vm36_vm0, %v53_v15, %v51_v14  ;;  %v37_v19 = vsel %vm36_vm0, %v35_v18, %v34_v17 }
  0x13   :  { %39 = vst.msk [vmem:[%s134_s1] sm:$0xff] %vm38_vm1, %v37_v19  }
  0x1a   :  { %56 = vrot.lane.b32.xlu0 %v55_v16, %s82_s23 }
  0x84   :  { %v47_v20 = vpop.permute.xlu0 %46   ;;  %v67_v21 = vpop.permute.xlu1 %66  }
  0x85   :  { %49 = vst.msk [vmem:[%s134_s1] sm:$0xff] %vm48_vm2, %v47_v20  }
  0x8c   :  { %v57_v22 = vpop.permute.xlu0 %56  }
  0x8d   :  { %59 = vst.msk [vmem:[%s134_s1] sm:$0xff] %vm58_vm3, %v57_v22  }
  0x8e   :  { %69 = vst.msk [vmem:[%s134_s1] sm:$0xff] %vm68_vm4, %v67_v21  }

// kernel: tile.18
= control target key start
LH: loop header
LB: loop body
LE: loop exit
PB: predicated region body
PF: predicated region fallthrough
CT: control target
= control target key end

     0   :  { %s22_s0 = inlined_call_operand.vmem [shape: f32[8], index: 0, kind: input, shape index: {}]   ;;  %s23_s1 = inlined_call_operand.vmem [shape: f32[4,8], index: 1, kind: output, shape index: {}]  }
   0x1   :  { %v4_v0 = vld [vmem:[%s22_s0] ss:$0 sm:$0xff] }
   0x2   :  { %5 = vst [vmem:[%s23_s1] sm:$0xf] %v4_v0 }

// kernel: tile.0
= control target key start
LH: loop header
LB: loop body
LE: loop exit
PB: predicated region body
PF: predicated region fallthrough
CT: control target
= control target key end

     0   :  { %s66_s8 = smov 125   ;;  %s67_s9 = smov 123   ;;  %vm7_vm0 = vcmask 7168   ;;  %s117_s0 = inlined_call_operand.vmem [shape: f32[4,8], index: 0, kind: input, shape index: {}]   ;;  %s118_s1 = inlined_call_operand.vmem [shape: f32[32,1], index: 1, kind: output, shape index: {}]  }
   0x1   :  { %v4_v0 = vld [vmem:[%s117_s0] sm:$0xf]  ;;  %s65_s0 = smov 127   ;;  %s68_s10 = smov 126  }
   0x2   :  { %5 = vst [vmem:[#allocation0] sm:$0xf] %v4_v0  ;;  %s69_s11 = smov 124   ;;  %s70_s12 = smov 122  }
   0x3   :  { %s71_s13 = smov 121  }
   0x9   :  { %v9_v1 = vld [vmem:[#allocation0] sm:$0xf]  }
   0xa   :  { %v21_v2 = vld [vmem:[#allocation0] sm:$0xf]   ;;  %10 = vrot.lane.b32.xlu0 %v9_v1, %s65_s0 }
   0xb   :  { %22 = vrot.lane.b32.xlu1 %v21_v2, %s66_s8  ;;  %v33_v3 = vld [vmem:[#allocation0] sm:$0xf]  }
   0xc   :  { %34 = vrot.lane.b32.xlu2 %v33_v3, %s67_s9  ;;  %v15_v4 = vld [vmem:[#allocation0] sm:$0xf]  }
   0xd   :  { %v27_v5 = vld [vmem:[#allocation0] sm:$0xf]  }
   0xe   :  { %v39_v6 = vld [vmem:[#allocation0] sm:$0xf]  }
   0xf   :  { %v45_v7 = vld [vmem:[#allocation0] sm:$0xf]  }
  0x10   :  { %v6_v8 = vld [vmem:[#allocation0] sm:$0xf]  }
  0x11   :  { %8 = vst.msk [vmem:[%s118_s1] ss:$8 sm:$0xf] %vm7_vm0, %v6_v8  }
  0x12   :  { %16 = vrot.lane.b32.xlu0 %v15_v4, %s68_s10 }
  0x13   :  { %28 = vrot.lane.b32.xlu1 %v27_v5, %s69_s11 }
  0x14   :  { %40 = vrot.lane.b32.xlu2 %v39_v6, %s70_s12 }
  0x1a   :  { %46 = vrot.lane.b32.xlu0 %v45_v7, %s71_s13 }
  0x66   :  { %v35_v9 = vpop.permute.xlu2 %34  }
  0x67   :  { %55 = vst.msk [vmem:[%s118_s1 + $0x5] ss:$8 sm:$0xf] %vm7_vm0, %v35_v9  }
  0x6e   :  { %v41_v10 = vpop.permute.xlu2 %40  }
  0x6f   :  { %56 = vst.msk [vmem:[%s118_s1 + $0x6] ss:$8 sm:$0xf] %vm7_vm0, %v41_v10  }
  0x7c   :  { %v11_v11 = vpop.permute.xlu0 %10  }
  0x7d   :  { %v23_v12 = vpop.permute.xlu1 %22   ;;  %51 = vst.msk [vmem:[%s118_s1 + $0x1] ss:$8 sm:$0xf] %vm7_vm0, %v11_v11  }
  0x7e   :  { %53 = vst.msk [vmem:[%s118_s1 + $0x3] ss:$8 sm:$0xf] %vm7_vm0, %v23_v12  }
  0x84   :  { %v17_v13 = vpop.permute.xlu0 %16  }
  0x85   :  { %v29_v14 = vpop.permute.xlu1 %28   ;;  %52 = vst.msk [vmem:[%s118_s1 + $0x2] ss:$8 sm:$0xf] %vm7_vm0, %v17_v13  }
  0x86   :  { %54 = vst.msk [vmem:[%s118_s1 + $0x4] ss:$8 sm:$0xf] %vm7_vm0, %v29_v14  }
  0x8c   :  { %v47_v15 = vpop.permute.xlu0 %46  }
  0x8d   :  { %57 = vst.msk [vmem:[%s118_s1 + $0x7] ss:$8 sm:$0xf] %vm7_vm0, %v47_v15  }

// kernel: conv_layer_forward.1
= control target key start
LH: loop header
LB: loop body
LE: loop exit
PB: predicated region body
PF: predicated region fallthrough
CT: control target
= control target key end

     0   :  { %s1153_s24 = smov 0   ;;  %s1155_s25 = smov 0   ;;  %s1311_s0 = inlined_call_operand.vmem [shape: f32[32,128], index: 0, kind: input, shape index: {}]   ;;  %s1312_s1 = inlined_call_operand.vmem [shape: f32[3,32,32], index: 1, kind: input, shape index: {}]   ;;  %s1313_s2 = inlined_call_operand.vmem [shape: f32[32,1], index: 2, kind: input, shape index: {}]   ;;  %s1314_s3 = inlined_call_operand.vmem [shape: f32[8,1], index: 3, kind: input, shape index: {}]   ;;  %s1315_s4 = inlined_call_operand.vmem [shape: f32[8,1], index: 4, kind: input, shape index: {}]   ;;  %s1316_s5 = inlined_call_operand.vmem [shape: f32[8,32], index: 5, kind: input, shape index: {}]   ;;  %s1317_s6 = inlined_call_operand.vmem [shape: f32[32,8], index: 6, kind: input, shape index: {}]   ;;  %s1318_s7 = inlined_call_operand.vmem [shape: f32[32,128], index: 7, kind: output, shape index: {}]  }
   0x1   :  { %s1157_s26 = smov 0  }
   0x2 LB: > { %s29_s27 = sadd.s32 1, %s1096_s25  ;;  %p964_p0 = scmp.ge.s32.totalorder %s1100_s26, 1  ;;  %s1100_s26 = sphi %s1157_s26, %s17_s26   ;;  %s1096_s25 = sphi %s1155_s25, %s1320_s25   ;;  %s1092_s24 = sphi %s1153_s24, %s1319_s24  }
   0x3   : > { %p31_p1 = scmp.ge.s32.totalorder %s29_s27, 2  ;;  %p260_p2 = scmp.lt.s32.totalorder %s1100_s26, 3 }
   0x5   : > { %s1322_s27 = smov (%p31_p1, %s29_s27), 0  ;;  %p261_p3 = pnand %p964_p0, %p260_p2 }
   0x6   : > { %p965_p4 = scmp.ne.s32.totalorder (!%p261_p3), %s1092_s24, 0 }
   0x7   : > { %264 = sbr.rel (%p261_p3) target bundleno = 1557 (0x615), region = 48 }
   0xc   : > { %316 = sbr.rel (%p965_p4) target bundleno = 578 (0x242), region = 52  ;;  %s1102_s13 = smov (!%p965_p4), 127  }
   0xd   : > { %s1103_s14 = smov (!%p965_p4), 1  }
  0x11   : > { %v326_v0 = vld [vmem:[%s1311_s0 + $0x10] sm:$0xff]  ;;  %v327_v1 = vld [vmem:[%s1311_s0 + $0x18] sm:$0xff]  ;;  %v324_v2 = vld [vmem:[%s1311_s0] sm:$0xff]  ;;  %vm345_vm0 = vcmask 261120   ;;  %v1104_v9 = vmov 0   ;;  %vm321_vm1 = vcmask 7168  }
  0x12   : > { %v1042_v3 = vpack.i.bf16 %v326_v0, %v327_v1  ;;  %v325_v4 = vld [vmem:[%s1311_s0 + $0x8] sm:$0xff]  ;;  %411 = vmatpush.msra.mxu1 %v327_v1  ;;  %v966_v6 = vld [vmem:[%s1312_s1 + $0x20] sm:$0xff]  ;;  %1064 = vset.pattern.permute.xlu1 %v1104_v9  ;;  %v968_v13 = vld [vmem:[%s1312_s1 + $0x30] sm:$0xff] }
  0x13   : > { %v1052_v5 = vpack.i.bf16 %v324_v2, %v325_v4  ;;  %v967_v7 = vld [vmem:[%s1312_s1 + $0x28] sm:$0xff]  ;;  %v486_v8 = vld [vmem:[%s1313_s2] sm:$0xff]  ;;  %1063 = vset.pattern.permute.xlu0 %v1104_v9  ;;  %1062 = vset.pattern.permute.xlu2 %v1104_v9  ;;  %v969_v22 = vld [vmem:[%s1312_s1 + $0x38] sm:$0xff] }
  0x14   : > { %1043 = vrot.lane.b32.xlu0 %v1042_v3, %s1102_s13  ;;  %412 = vmatpush.msra.mxu1 %v326_v0  ;;  %v487_v14 = vld [vmem:[%s1313_s2 + $0x8] sm:$0xff]  ;;  %v978_v18 = vld [vmem:[%s1312_s1 + $0x40] sm:$0xff]  ;;  %v489_v23 = vld [vmem:[%s1313_s2 + $0x18] sm:$0xff] }
  0x15   : > { %1053 = vrot.lane.b32.xlu1 %v1052_v5, %s1102_s13  ;;  %507 = vperm.xlu2 %1062, %v489_v23   ;;  %v333_v27 = vld [vmem:[%s1312_s1] sm:$0xff]  ;;  %v979_v28 = vld [vmem:[%s1312_s1 + $0x48] sm:$0xff]  ;;  %v488_v29 = vld [vmem:[%s1313_s2 + $0x10] sm:$0xff] }
  0x16   : > { %413 = vmatpush.msra.mxu1 %v325_v4  ;;  %v334_v30 = vld [vmem:[%s1312_s1 + $0x8] sm:$0xff]  ;;  %v980_v31 = vld [vmem:[%s1312_s1 + $0x50] sm:$0xff]  ;;  %v981_v33 = vld [vmem:[%s1312_s1 + $0x58] sm:$0xff] }
  0x17   : > { %v335_v32 = vld [vmem:[%s1312_s1 + $0x10] sm:$0xff]  ;;  %v336_v34 = vld [vmem:[%s1312_s1 + $0x18] sm:$0xff] }
  0x18   : > { %414 = vmatpush.msra.mxu1 %v324_v2 }
  0x19   : > { %974 = vmatmul.msk.f32.vlgmr.msra.gmra.mxu1 %vm345_vm0, %v966_v6 }
  0x1c   : > { %1048 = vrot.lane.b32.xlu0 %v1042_v3, %s1103_s14  ;;  %v1105_v3 = vmov 0.0  }
  0x1d   : > { %1058 = vrot.lane.b32.xlu1 %v1052_v5, %s1103_s14  ;;  %502 = vperm.xlu2 %1062, %v488_v29   ;;  %322 = vst.msk [vmem:[#allocation3] sm:$0xff] %vm321_vm1, %v1105_v3 }
  0x1e   : > { %323 = vst.msk [vmem:[#allocation4] sm:$0xff] %vm321_vm1, %v1105_v3 }
  0x21   : > { %975 = vmatmul.msk.f32.gmra.mxu1 %vm345_vm0, %v967_v7 }
  0x24   : > { %497 = vperm.xlu0 %1063, %v487_v14  }
  0x25   : > { %492 = vperm.xlu1 %1064, %v486_v8   ;;  %v541_v8 = vld [vmem:[%s1316_s5] sm:$0xff] }
  0x29   : > { %976 = vmatmul.msk.f32.gmra.mxu1 %vm345_vm0, %v968_v13  ;;  %v540_v13 = vld [vmem:[#allocation3] sm:$0xff] }
  0x31   : > { %977 = vmatmul.msk.f32.gmra.mxu1 %vm345_vm0, %v969_v22 }
  0x6f   : > { %v508_v45 = vpop.permute.xlu2 %507 }
  0x77   : > { %v503_v54 = vpop.permute.xlu2 %502 }
  0x86   : > { %v1044_v10 = vpop.permute.xlu0 %1043 }
  0x87   : > { %v1045_v11 = vunpack.i.l.bf16 %v1044_v10  ;;  %v1054_v12 = vpop.permute.xlu1 %1053  ;;  %v1046_v15 = vunpack.i.h.bf16 %v1044_v10 }
  0x88   : > { %v1055_v16 = vunpack.i.l.bf16 %v1054_v12  ;;  %v1056_v17 = vunpack.i.h.bf16 %v1054_v12 }
  0x89   : > { %465 = vmatpush.msra.mxu2 %v1045_v11 }
  0x8b   : > { %466 = vmatpush.msra.mxu2 %v1046_v15 }
  0x8d   : > { %467 = vmatpush.msra.mxu2 %v1055_v16  ;;  %v568_v16 = vld [vmem:[#allocation4] sm:$0xff] }
  0x8e   : > { %v1049_v19 = vpop.permute.xlu0 %1048 }
  0x8f   : > { %468 = vmatpush.msra.mxu2 %v1056_v17  ;;  %v1050_v20 = vunpack.i.l.bf16 %v1049_v19  ;;  %v1059_v21 = vpop.permute.xlu1 %1058  ;;  %v1051_v24 = vunpack.i.h.bf16 %v1049_v19 }
  0x90   : > { %982 = vmatmul.msk.f32.vlgmr.msra.gmra.mxu2 %vm345_vm0, %v978_v18  ;;  %v1060_v25 = vunpack.i.l.bf16 %v1059_v21  ;;  %v1061_v26 = vunpack.i.h.bf16 %v1059_v21 }
  0x91   : > { %370 = vmatpush.msra.mxu0 %v1050_v20 }
  0x93   : > { %371 = vmatpush.msra.mxu0 %v1051_v24 }
  0x95   : > { %372 = vmatpush.msra.mxu0 %v1060_v25 }
  0x96   : > { %v416_v35 = vpop.f32.mrf.mxu1  ;;  %v498_v47 = vpop.permute.xlu0 %497 }
  0x97   : > { %373 = vmatpush.msra.mxu0 %v1061_v26  ;;  %v493_v39 = vpop.permute.xlu1 %492 }
  0x98   : > { %970 = vmatmul.msk.f32.vlgmr.msra.gmra.mxu0 %vm345_vm0, %v333_v27  ;;  %983 = vmatmul.msk.f32.gmra.mxu2 %vm345_vm0, %v979_v28 }
  0x9e   : > { %v419_v40 = vpop.f32.mrf.mxu1 }
  0xa0   : > { %971 = vmatmul.msk.f32.gmra.mxu0 %vm345_vm0, %v334_v30  ;;  %984 = vmatmul.msk.f32.gmra.mxu2 %vm345_vm0, %v980_v31 }
  0xa6   : > { %v422_v49 = vpop.f32.mrf.mxu1 }
  0xa8   : > { %972 = vmatmul.msk.f32.gmra.mxu0 %vm345_vm0, %v335_v32  ;;  %985 = vmatmul.msk.f32.gmra.mxu2 %vm345_vm0, %v981_v33 }
  0xae   : > { %v425_v58 = vpop.f32.mrf.mxu1 }
  0xb0   : > { %973 = vmatmul.msk.f32.gmra.mxu0 %vm345_vm0, %v336_v34 }
 0x113   : > { %v470_v36 = vpop.f32.mrf.mxu2 }
 0x115   : > { %v375_v37 = vpop.f32.mrf.mxu0 }
 0x116   : > { %v417_v38 = vadd.f32 %v416_v35, %v375_v37 }
 0x118   : > { %v482_v41 = vadd.f32 %v470_v36, %v417_v38 }
 0x11a   : > { %v510_v42 = vadd.f32 %v493_v39, %v482_v41 }
 0x11b   : > { %v473_v43 = vpop.f32.mrf.mxu2 }
 0x11c   : > { %516 = vst [vmem:[#allocation2 + $0x10] sm:$0xff] %v510_v42  ;;  %520 = vadd.xlane.f32.xlu2 %v510_v42  ;;  %v528_v57 = vmul.f32 %v510_v42, %v510_v42 }
 0x11d   : > { %v378_v44 = vpop.f32.mrf.mxu0 }
 0x11e   : > { %v420_v46 = vadd.f32 %v419_v40, %v378_v44 }
 0x120   : > { %v483_v48 = vadd.f32 %v473_v43, %v420_v46 }
 0x122   : > { %v511_v50 = vadd.f32 %v498_v47, %v483_v48 }
 0x123   : > { %v476_v51 = vpop.f32.mrf.mxu2 }
 0x124   : > { %517 = vst [vmem:[#allocation2] sm:$0xff] %v511_v50  ;;  %522 = vadd.xlane.f32.xlu0 %v511_v50  ;;  %v529_v2 = vmul.f32 %v511_v50, %v511_v50 }
 0x125   : > { %v381_v52 = vpop.f32.mrf.mxu0 }
 0x126   : > { %v423_v53 = vadd.f32 %v422_v49, %v381_v52 }
 0x128   : > { %v484_v55 = vadd.f32 %v476_v51, %v423_v53 }
 0x12a   : > { %v512_v56 = vadd.f32 %v503_v54, %v484_v55 }
 0x12b   : > { %v479_v60 = vpop.f32.mrf.mxu2 }
 0x12c   : > { %518 = vst [vmem:[#allocation2 + $0x18] sm:$0xff] %v512_v56  ;;  %524 = vadd.xlane.f32.xlu1 %v512_v56  ;;  %532 = vadd.xlane.f32.xlu0 %v528_v57  ;;  %v530_v0 = vmul.f32 %v512_v56, %v512_v56 }
 0x12d   : > { %v384_v59 = vpop.f32.mrf.mxu0 }
 0x12e   : > { %v426_v61 = vadd.f32 %v425_v58, %v384_v59 }
 0x130   : > { %v485_v62 = vadd.f32 %v479_v60, %v426_v61 }
 0x132   : > { %v513_v63 = vadd.f32 %v508_v45, %v485_v62 }
 0x134   : > { %519 = vst [vmem:[#allocation2 + $0x8] sm:$0xff] %v513_v63  ;;  %536 = vadd.xlane.f32.xlu1 %v530_v0  ;;  %526 = vadd.xlane.f32.xlu2 %v513_v63  ;;  %v531_v1 = vmul.f32 %v513_v63, %v513_v63 }
 0x13c   : > { %538 = vadd.xlane.f32.xlu2 %v531_v1 }
 0x144   : > { %534 = vadd.xlane.f32.xlu2 %v529_v2 }
 0x18f   : > { %v521_v4 = vpop.xlane.xlu2 %520 }
 0x197   : > { %v523_v7 = vpop.xlane.xlu0 %522 }
 0x19f   : > { %v525_v5 = vpop.xlane.xlu1 %524  ;;  %v533_v12 = vpop.xlane.xlu0 %532 }
 0x1a7   : > { %v527_v6 = vpop.xlane.xlu2 %526  ;;  %v537_v10 = vpop.xlane.xlu1 %536 }
 0x1a8   : > { %557 = vmatpush.msra.mxu3 %v527_v6 }
 0x1aa   : > { %558 = vmatpush.msra.mxu3 %v525_v5 }
 0x1ac   : > { %559 = vmatpush.msra.mxu3 %v523_v7 }
 0x1ae   : > { %560 = vmatpush.msra.mxu3 %v521_v4 }
 0x1af   : > { %v539_v9 = vpop.xlane.xlu2 %538  ;;  %986 = vmatmul.msk.f32.vlgmr.msra.gmra.mxu3 %vm345_vm0, %v541_v8 }
 0x1b0   : > { %585 = vmatpush.msrb.mxu3 %v539_v9 }
 0x1b2   : > { %586 = vmatpush.msrb.mxu3 %v537_v10 }
 0x1b7   : > { %v535_v11 = vpop.xlane.xlu2 %534 }
 0x1b8   : > { %587 = vmatpush.msrb.mxu3 %v535_v11 }
 0x1ba   : > { %588 = vmatpush.msrb.mxu3 %v533_v12 }
 0x1bb   : > { %987 = vmatmul.msk.f32.vlgmr.msrb.gmra.mxu3 %vm345_vm0, %v541_v8 }
 0x232   : > { %v562_v14 = vpop.f32.mrf.mxu3 }
 0x233   : > { %v565_v15 = vadd.f32 %v562_v14, %v540_v13 }
 0x235   : > { %567 = vst.msk [vmem:[#allocation3] sm:$0xff] %vm321_vm1, %v565_v15 }
 0x23e   : > { %v590_v17 = vpop.f32.mrf.mxu3 }
 0x23f   : > { %v593_v18 = vadd.f32 %v590_v17, %v568_v16 }
 0x241   : > { %594 = vst.msk [vmem:[#allocation4] sm:$0xff] %vm321_vm1, %v593_v18 }
 0x242 PF: > { %p988_p5 = scmp.ne.s32.totalorder %s1092_s24, 1 }
 0x243   : > { %s1107_s22 = smov (!%p988_p5), 127   ;;  %s1108_s23 = smov (!%p988_p5), 126  }
 0x244   : > { %598 = sbr.rel (%p988_p5) target bundleno = 1557 (0x615), region = 60  ;;  %s1109_s28 = smov (!%p988_p5), 124  }
 0x245   : > { %s1110_s29 = smov (!%p988_p5), 120   ;;  %s1111_s30 = smov (!%p988_p5), 112  }
 0x246   : > { %s1112_s8 = smov (!%p988_p5), 108  }
 0x249   : > { %v603_v19 = vld [vmem:[#allocation3] sm:$0xff]  ;;  %v605_v20 = vld [vmem:[#allocation4] sm:$0xff]  ;;  %vm629_vm5 = vcmask 64512   ;;  %v627_v36 = vld [vmem:[%s1317_s6 + $0x10] sm:$0xff]  ;;  %v1106_v42 = vmov 0   ;;  %vm671_vm6 = vcmask 7168  }
 0x24a   : > { %v604_v21 = vmul.f32 0.001953125, %v603_v19  ;;  %v606_v22 = vmul.f32 0.001953125, %v605_v20  ;;  %v609_v31 = vld [vmem:[%s1314_s3] sm:$0xff]  ;;  %v626_v40 = vld [vmem:[%s1317_s6 + $0x8] sm:$0xff]  ;;  %v628_v41 = vld [vmem:[%s1317_s6 + $0x18] sm:$0xff]  ;;  %1065 = vset.pattern.permute.xlu0 %v1106_v42  ;;  %1067 = vset.pattern.permute.xlu1 %v1106_v42 }
 0x24b   : > { %v625_v35 = vld [vmem:[%s1317_s6] sm:$0xff]  ;;  %1066 = vset.pattern.permute.xlu2 %v1106_v42  ;;  %v727_v59 = vld [vmem:[#allocation2 + $0x10] sm:$0xff]  ;;  %v729_v8 = vld [vmem:[#allocation2 + $0x18] sm:$0xff] }
 0x24c   : > { %v607_v23 = vmul.f32 %v604_v21, %v604_v21  ;;  %v622_v37 = vld [vmem:[%s1315_s4] sm:$0xff]  ;;  %v730_v17 = vld [vmem:[#allocation2 + $0x8] sm:$0xff] }
 0x24d   : > { %v728_v2 = vld [vmem:[#allocation2] sm:$0xff] }
 0x24e   : > { %v608_v24 = vsub.f32 %v606_v22, %v607_v23 }
 0x250   : > { %v610_v25 = vadd.f32 1e-05, %v608_v24 }
 0x252   : > { %1068 = vrsqrt.f32 %v610_v25  ;;  %vm617_vm2 = vweird.f32 %v610_v25 }
 0x258   : > { %v1069_v26 = vpop.eup %1068 }
 0x259   : > { %v612_v27 = vmul.f32 %v1069_v26, %v610_v25  ;;  %vm618_vm3 = vweird.f32 %v1069_v26 }
 0x25a   : > { %vm619_vm4 = vmor %vm617_vm2, %vm618_vm3 }
 0x25b   : > { %v613_v28 = vmul.f32 %v1069_v26, %v612_v27 }
 0x25d   : > { %v614_v29 = vmul.f32 0.5, %v613_v28 }
 0x25f   : > { %v615_v30 = vsub.f32 1.5, %v614_v29 }
 0x261   : > { %v616_v32 = vmul.f32 %v1069_v26, %v615_v30 }
 0x263   : > { %v620_v33 = vsel %vm619_vm4, %v1069_v26, %v616_v32 }
 0x264   : > { %v621_v34 = vmul.f32 %v620_v33, %v609_v31 }
 0x266   : > { %657 = vmatpush.msra.mxu0 %v621_v34  ;;  %1005 = vmatpush.msra.mxu2 %v621_v34  ;;  %v623_v38 = vmul.f32 %v621_v34, %v604_v21 }
 0x267   : > { %989 = vmatmul.msk.f32.vlgmr.msra.gmra.mxu0 %vm629_vm5, %v625_v35  ;;  %991 = vmatmul.msk.f32.vlgmr.msra.gmra.mxu2 %vm629_vm5, %v627_v36 }
 0x268   : > { %v624_v39 = vsub.f32 %v622_v37, %v623_v38 }
 0x26a   : > { %1006 = vmatpush.msra.mxu3 %v624_v39  ;;  %707 = vmatpush.msra.mxu1 %v624_v39 }
 0x26b   : > { %995 = vmatmul.msk.f32.vlgmr.msra.gmra.mxu3 %vm629_vm5, %v627_v36  ;;  %993 = vmatmul.msk.f32.vlgmr.msra.gmra.mxu1 %vm629_vm5, %v625_v35 }
 0x26f   : > { %990 = vmatmul.msk.f32.gmra.mxu0 %vm629_vm5, %v626_v40  ;;  %992 = vmatmul.msk.f32.gmra.mxu2 %vm629_vm5, %v628_v41 }
 0x273   : > { %996 = vmatmul.msk.f32.gmra.mxu3 %vm629_vm5, %v628_v41  ;;  %994 = vmatmul.msk.f32.gmra.mxu1 %vm629_vm5, %v626_v40 }
 0x2e4   : > { %v659_v43 = vpop.f32.mrf.mxu0 }
 0x2e5   : > { %672 = vst.msk [vmem:[#allocation5] sm:$0xff] %vm671_vm6, %v659_v43 }
 0x2e8   : > { %v709_v44 = vpop.f32.mrf.mxu1 }
 0x2e9   : > { %721 = vst.msk [vmem:[#allocation6] sm:$0xff] %vm671_vm6, %v709_v44 }
 0x2ea   : > { %v665_v45 = vpop.f32.mrf.mxu2 }
 0x2eb   : > { %674 = vst.msk [vmem:[#allocation5 + $0x10] sm:$0xff] %vm671_vm6, %v665_v45 }
 0x2ec   : > { %v662_v46 = vpop.f32.mrf.mxu0  ;;  %v731_v47 = vld [vmem:[#allocation5] sm:$0xff] }
 0x2ed   : > { %673 = vst.msk [vmem:[#allocation5 + $0x8] sm:$0xff] %vm671_vm6, %v662_v46  ;;  %737 = vperm.xlu0 %1065, %v731_v47  }
 0x2ee   : > { %v715_v48 = vpop.f32.mrf.mxu3 }
 0x2ef   : > { %723 = vst.msk [vmem:[#allocation6 + $0x10] sm:$0xff] %vm671_vm6, %v715_v48 }
 0x2f0   : > { %v712_v49 = vpop.f32.mrf.mxu1  ;;  %v759_v50 = vld [vmem:[#allocation6] sm:$0xff] }
 0x2f1   : > { %722 = vst.msk [vmem:[#allocation6 + $0x8] sm:$0xff] %vm671_vm6, %v712_v49  ;;  %765 = vperm.xlu2 %1066, %v759_v50  }
 0x2f2   : > { %v668_v51 = vpop.f32.mrf.mxu2  ;;  %v733_v52 = vld [vmem:[#allocation5 + $0x10] sm:$0xff] }
 0x2f3   : > { %675 = vst.msk [vmem:[#allocation5 + $0x18] sm:$0xff] %vm671_vm6, %v668_v51  ;;  %747 = vperm.xlu1 %1067, %v733_v52  }
 0x2f4   : > { %v732_v53 = vld [vmem:[#allocation5 + $0x8] sm:$0xff] }
 0x2f5   : > { %742 = vperm.xlu0 %1065, %v732_v53  }
 0x2f6   : > { %v718_v54 = vpop.f32.mrf.mxu3  ;;  %v761_v57 = vld [vmem:[#allocation6 + $0x10] sm:$0xff] }
 0x2f7   : > { %724 = vst.msk [vmem:[#allocation6 + $0x18] sm:$0xff] %vm671_vm6, %v718_v54 }
 0x2f8   : > { %v760_v55 = vld [vmem:[#allocation6 + $0x8] sm:$0xff] }
 0x2f9   : > { %770 = vperm.xlu2 %1066, %v760_v55  }
 0x2fa   : > { %v734_v56 = vld [vmem:[#allocation5 + $0x18] sm:$0xff] }
 0x2fb   : > { %752 = vperm.xlu1 %1067, %v734_v56  }
 0x2fd   : > { %775 = vperm.xlu0 %1065, %v761_v57  }
 0x2fe   : > { %v762_v58 = vld [vmem:[#allocation6 + $0x18] sm:$0xff] }
 0x303   : > { %780 = vperm.xlu1 %1067, %v762_v58  }
 0x34b   : > { %v766_v60 = vpop.permute.xlu2 %765 }
 0x353   : > { %v771_v5 = vpop.permute.xlu2 %770 }
 0x35f   : > { %v738_v61 = vpop.permute.xlu0 %737 }
 0x360   : > { %v755_v62 = vmul.f32 %v738_v61, %v727_v59 }
 0x362   : > { %v783_v63 = vadd.f32 %v766_v60, %v755_v62 }
 0x364   : > { %v791_v0 = vmin.f32 %v783_v63, 0.0  ;;  %vm787_vm7 = vcmp.gt.f32.partialorder %v783_v63, 0.0 }
 0x365   : > { %v748_v1 = vpop.permute.xlu1 %747 }
 0x366   : > { %v795_v3 = vmul.f32 1.442695, %v791_v0  ;;  %v757_v12 = vmul.f32 %v748_v1, %v729_v8 }
 0x367   : > { %v743_v4 = vpop.permute.xlu0 %742 }
 0x368   : > { %1070 = vpow2.f32 %v795_v3  ;;  %v756_v6 = vmul.f32 %v743_v4, %v728_v2 }
 0x36a   : > { %v784_v7 = vadd.f32 %v771_v5, %v756_v6 }
 0x36c   : > { %v792_v9 = vmin.f32 %v784_v7, 0.0  ;;  %vm788_vm8 = vcmp.gt.f32.partialorder %v784_v7, 0.0 }
 0x36d   : > { %v753_v10 = vpop.permute.xlu1 %752 }
 0x36e   : > { %v1071_v11 = vpop.eup %1070  ;;  %v797_v13 = vmul.f32 1.442695, %v792_v9  ;;  %v758_v20 = vmul.f32 %v753_v10, %v730_v17 }
 0x36f   : > { %v776_v14 = vpop.permute.xlu0 %775  ;;  %v997_v15 = vadd.f32 -1.0, %v1071_v11 }
 0x370   : > { %1072 = vpow2.f32 %v797_v13  ;;  %v785_v16 = vadd.f32 %v776_v14, %v757_v12 }
 0x371   : > { %v807_v18 = vsel %vm787_vm7, %v783_v63, %v997_v15 }
 0x372   : > { %v793_v19 = vmin.f32 %v785_v16, 0.0  ;;  %811 = vrot.lane.b32.xlu2 %v807_v18, %s1107_s22  ;;  %vm789_vm9 = vcmp.gt.f32.partialorder %v785_v16, 0.0 }
 0x374   : > { %v799_v21 = vmul.f32 1.442695, %v793_v19 }
 0x375   : > { %v781_v22 = vpop.permute.xlu1 %780 }
 0x376   : > { %v1073_v23 = vpop.eup %1072  ;;  %1074 = vpow2.f32 %v799_v21  ;;  %v786_v24 = vadd.f32 %v781_v22, %v758_v20 }
 0x377   : > { %v998_v25 = vadd.f32 -1.0, %v1073_v23 }
 0x378   : > { %v794_v26 = vmin.f32 %v786_v24, 0.0  ;;  %vm790_vm10 = vcmp.gt.f32.partialorder %v786_v24, 0.0 }
 0x379   : > { %v808_v27 = vsel %vm788_vm8, %v784_v7, %v998_v25 }
 0x37a   : > { %v801_v28 = vmul.f32 1.442695, %v794_v26  ;;  %813 = vrot.lane.b32.xlu0 %v808_v27, %s1107_s22 }
 0x37c   : > { %v1075_v29 = vpop.eup %1074  ;;  %1076 = vpow2.f32 %v801_v28 }
 0x37d   : > { %v999_v30 = vadd.f32 -1.0, %v1075_v29 }
 0x37f   : > { %v809_v31 = vsel %vm789_vm9, %v785_v16, %v999_v30 }
 0x380   : > { %815 = vrot.lane.b32.xlu1 %v809_v31, %s1107_s22 }
 0x382   : > { %v1077_v32 = vpop.eup %1076 }
 0x383   : > { %v1000_v33 = vadd.f32 -1.0, %v1077_v32 }
 0x385   : > { %v810_v34 = vsel %vm790_vm10, %v786_v24, %v1000_v33 }
 0x386   : > { %817 = vrot.lane.b32.xlu2 %v810_v34, %s1107_s22 }
 0x3cc   : > { %v812_v35 = vpop.permute.xlu2 %811 }
 0x3cd   : > { %v819_v36 = vmax.f32 %v807_v18, %v812_v35 }
 0x3cf   : > { %823 = vrot.lane.b32.xlu0 %v819_v36, %s1108_s23 }
 0x3e0   : > { %v818_v37 = vpop.permute.xlu2 %817 }
 0x3e1   : > { %v822_v38 = vmax.f32 %v810_v34, %v818_v37 }
 0x3e3   : > { %829 = vrot.lane.b32.xlu0 %v822_v38, %s1108_s23 }
 0x3ec   : > { %v814_v39 = vpop.permute.xlu0 %813 }
 0x3ed   : > { %v820_v40 = vmax.f32 %v808_v27, %v814_v39 }
 0x3ef   : > { %825 = vrot.lane.b32.xlu1 %v820_v40, %s1108_s23 }
 0x3f2   : > { %v816_v41 = vpop.permute.xlu1 %815 }
 0x3f3   : > { %v821_v42 = vmax.f32 %v809_v31, %v816_v41 }
 0x3f5   : > { %827 = vrot.lane.b32.xlu2 %v821_v42, %s1108_s23 }
 0x441   : > { %v824_v43 = vpop.permute.xlu0 %823 }
 0x442   : > { %v831_v44 = vmax.f32 %v819_v36, %v824_v43 }
 0x444   : > { %835 = vrot.lane.b32.xlu1 %v831_v44, %s1109_s28 }
 0x44f   : > { %v828_v45 = vpop.permute.xlu2 %827 }
 0x450   : > { %v833_v46 = vmax.f32 %v821_v42, %v828_v45 }
 0x452   : > { %839 = vrot.lane.b32.xlu0 %v833_v46, %s1109_s28 }
 0x455   : > { %v830_v47 = vpop.permute.xlu0 %829 }
 0x456   : > { %v834_v48 = vmax.f32 %v822_v38, %v830_v47 }
 0x458   : > { %841 = vrot.lane.b32.xlu1 %v834_v48, %s1109_s28 }
 0x461   : > { %v826_v49 = vpop.permute.xlu1 %825 }
 0x462   : > { %v832_v50 = vmax.f32 %v820_v40, %v826_v49 }
 0x464   : > { %837 = vrot.lane.b32.xlu2 %v832_v50, %s1109_s28 }
 0x4b6   : > { %v836_v51 = vpop.permute.xlu1 %835 }
 0x4b7   : > { %v843_v52 = vmax.f32 %v831_v44, %v836_v51 }
 0x4b9   : > { %847 = vrot.lane.b32.xlu2 %v843_v52, %s1110_s29 }
 0x4be   : > { %v838_v53 = vpop.permute.xlu2 %837 }
 0x4bf   : > { %v844_v54 = vmax.f32 %v832_v50, %v838_v53 }
 0x4c1   : > { %849 = vrot.lane.b32.xlu0 %v844_v54, %s1110_s29 }
 0x4c4   : > { %v840_v55 = vpop.permute.xlu0 %839 }
 0x4c5   : > { %v845_v56 = vmax.f32 %v833_v46, %v840_v55 }
 0x4c7   : > { %851 = vrot.lane.b32.xlu1 %v845_v56, %s1110_s29 }
 0x4ca   : > { %v842_v57 = vpop.permute.xlu1 %841 }
 0x4cb   : > { %v846_v58 = vmax.f32 %v834_v48, %v842_v57 }
 0x4cd   : > { %853 = vrot.lane.b32.xlu2 %v846_v58, %s1110_s29 }
 0x513   : > { %v848_v59 = vpop.permute.xlu2 %847 }
 0x514   : > { %v855_v60 = vmax.f32 %v843_v52, %v848_v59 }
 0x516   : > { %859 = vrot.lane.b32.xlu0 %v855_v60, %s1111_s30 }
 0x527   : > { %v854_v61 = vpop.permute.xlu2 %853 }
 0x528   : > { %v858_v62 = vmax.f32 %v846_v58, %v854_v61 }
 0x52a   : > { %865 = vrot.lane.b32.xlu0 %v858_v62, %s1111_s30 }
 0x533   : > { %v850_v63 = vpop.permute.xlu0 %849 }
 0x534   : > { %v856_v0 = vmax.f32 %v844_v54, %v850_v63 }
 0x536   : > { %861 = vrot.lane.b32.xlu1 %v856_v0, %s1111_s30 }
 0x539   : > { %v852_v1 = vpop.permute.xlu1 %851 }
 0x53a   : > { %v857_v2 = vmax.f32 %v845_v56, %v852_v1 }
 0x53c   : > { %863 = vrot.lane.b32.xlu2 %v857_v2, %s1111_s30 }
 0x588   : > { %v860_v3 = vpop.permute.xlu0 %859 }
 0x589   : > { %v867_v4 = vmax.f32 %v855_v60, %v860_v3 }
 0x58b   : > { %871 = vrot.lane.b32.xlu1 %v867_v4, %s1112_s8 }
 0x596   : > { %v864_v5 = vpop.permute.xlu2 %863 }
 0x597   : > { %v869_v6 = vmax.f32 %v857_v2, %v864_v5 }
 0x599   : > { %875 = vrot.lane.b32.xlu0 %v869_v6, %s1112_s8 }
 0x59c   : > { %v866_v7 = vpop.permute.xlu0 %865 }
 0x59d   : > { %v870_v8 = vmax.f32 %v858_v62, %v866_v7 }
 0x59f   : > { %877 = vrot.lane.b32.xlu1 %v870_v8, %s1112_s8 }
 0x5a8   : > { %v862_v9 = vpop.permute.xlu1 %861 }
 0x5a9   : > { %v868_v10 = vmax.f32 %v856_v0, %v862_v9 }
 0x5ab   : > { %873 = vrot.lane.b32.xlu2 %v868_v10, %s1112_s8 }
 0x5fd   : > { %v872_v11 = vpop.permute.xlu1 %871 }
 0x5fe   : > { %v879_v12 = vmax.f32 %v867_v4, %v872_v11 }
 0x600   : > { %883 = vst [vmem:[%s1318_s7] sm:$0xff] %v879_v12 }
 0x605   : > { %v874_v13 = vpop.permute.xlu2 %873 }
 0x606   : > { %v880_v14 = vmax.f32 %v868_v10, %v874_v13 }
 0x608   : > { %884 = vst [vmem:[%s1318_s7 + $0x8] sm:$0xff] %v880_v14 }
 0x60b   : > { %v876_v15 = vpop.permute.xlu0 %875 }
 0x60c   : > { %v881_v16 = vmax.f32 %v869_v6, %v876_v15 }
 0x60e   : > { %885 = vst [vmem:[%s1318_s7 + $0x10] sm:$0xff] %v881_v16 }
 0x611   : > { %v878_v17 = vpop.permute.xlu1 %877 }
 0x612   : > { %v882_v18 = vmax.f32 %v870_v8, %v878_v17 }
 0x614   : > { %886 = vst [vmem:[%s1318_s7 + $0x18] sm:$0xff] %v882_v18 }
 0x615 PF: > { %s17_s26 = sadd.s32 1, %s1100_s26   ;;  %s1319_s24 = smov %s1096_s25 }
 0x616   : > { %p14_p6 = scmp.ge.s32.totalorder %s17_s26, 4   ;;  %s1320_s25 = smov %s1322_s27 }
 0x618   :  { %16 = sbr.rel (!%p14_p6) target bundleno = 2 (0x2), region = 98 }

</bundles_post_ra>
